<compile_context>
chip_gen: v7x
topology: tpu7x:2x2x1
jax: 0.10.0
libtpu: 0.0.40
codegen_flags: <defaults>
</compile_context>

<pallas_src>
import jax
import jax.numpy as jnp
from jax.experimental import pallas as pl
from jax.experimental.pallas import tpu as pltpu


def _round_up(x, m):
    return ((x + m - 1) // m) * m


def mlp_kernel(x_ref, w_in_ref, b_in_ref, w_eff_ref, b_eff_ref, o_ref):
    # Input linear + ReLU  (one MXU pass)
    h = jnp.dot(x_ref[...], w_in_ref[...], preferred_element_type=jnp.float32)
    h = jnp.maximum(h + b_in_ref[...], 0.0)
    # Folded (hidden_1..hidden_L + output) linear + sigmoid  (one MXU pass)
    y = jnp.dot(h, w_eff_ref[...], preferred_element_type=jnp.float32)
    o_ref[...] = jax.nn.sigmoid(y + b_eff_ref[...]).astype(o_ref.dtype)


def fold_tail_params(w_hid, b_hid, w_out, b_out):
    """Collapse activation-free hidden chain + output linear into one (W_eff, b_eff).

    All weights are in (in, out) layout; w_hid is (L, N, N), b_hid is (L, N).
    """
    L = w_hid.shape[0]
    if L == 0:
        return w_out, b_out
    w_eff = w_hid[0]
    b_eff = b_hid[0]
    for i in range(1, L):
        b_eff = b_eff @ w_hid[i] + b_hid[i]
        w_eff = w_eff @ w_hid[i]
    b_eff = b_eff @ w_out + b_out
    w_eff = w_eff @ w_out
    return w_eff, b_eff


def mlp_forward(x, w_in, b_in, w_hid, b_hid, w_out, b_out, *, batch_tile=512):
    """All weights already in (in, out) layout; hidden weights stacked (L, N, N)."""
    B, F = x.shape
    N = w_in.shape[1]
    OUT = w_out.shape[1]

    # --- trace-time algebraic folding of the activation-free tail ---
    w_eff, b_eff = fold_tail_params(w_hid, b_hid, w_out, b_out)

    # --- pad feature dims to 128 lanes, batch to the tile size ---
    F_p = _round_up(F, 128)
    N_p = _round_up(N, 128)
    O_p = _round_up(OUT, 128)
    TB = min(batch_tile, _round_up(B, 8))
    B_p = _round_up(B, TB)

    f32 = jnp.float32
    x_p = jnp.zeros((B_p, F_p), f32).at[:B, :F].set(x.astype(f32))
    w_in_p = jnp.zeros((F_p, N_p), f32).at[:F, :N].set(w_in)
    b_in_p = jnp.zeros((1, N_p), f32).at[0, :N].set(b_in)
    w_eff_p = jnp.zeros((N_p, O_p), f32).at[:N, :OUT].set(w_eff)
    b_eff_p = jnp.zeros((1, O_p), f32).at[0, :OUT].set(b_eff)

    grid = (B_p // TB,)
    cost = pl.CostEstimate(
        flops=2 * B_p * (F_p * N_p + N_p * O_p),
        transcendentals=B_p * O_p,
        bytes_accessed=4 * (B_p * F_p + F_p * N_p + N_p
                            + N_p * O_p + O_p + B_p * O_p),
    )

    out_p = pl.pallas_call(
        mlp_kernel,
        out_shape=jax.ShapeDtypeStruct((B_p, O_p), f32),
        grid=grid,
        in_specs=[
            pl.BlockSpec((TB, F_p), lambda i: (i, 0)),      # activations: tiled over batch
            pl.BlockSpec((F_p, N_p), lambda i: (0, 0)),     # weights: VMEM-resident
            pl.BlockSpec((1, N_p), lambda i: (0, 0)),
            pl.BlockSpec((N_p, O_p), lambda i: (0, 0)),
            pl.BlockSpec((1, O_p), lambda i: (0, 0)),
        ],
        out_specs=pl.BlockSpec((TB, O_p), lambda i: (i, 0)),
        compiler_params=pltpu.CompilerParams(
            dimension_semantics=("parallel",)),
        cost_estimate=cost,
    )(x_p, w_in_p, b_in_p, w_eff_p, b_eff_p)

    # Strip batch padding and the lane padding (pad lanes hold sigmoid(0)=0.5).
    return out_p[:B, :OUT]


def init_linear_params(key, fan_in, fan_out):
    """Deterministic init mimicking PyTorch nn.Linear default (uniform +-1/sqrt(fan_in))."""
    k_w, k_b = jax.random.split(key)
    bound = 1.0 / jnp.sqrt(fan_in)
    # PyTorch stores weight as (out, in); we return the transposed (in, out) layout.
    w = jax.random.uniform(k_w, (fan_in, fan_out), jnp.float32, -bound, bound)
    b = jax.random.uniform(k_b, (fan_out,), jnp.float32, -bound, bound)
    return w, b


if __name__ == "__main__":
    # Net(num_of_neurones=32, num_of_hidden_layers=2, num_of_inputs=16, num_of_outputs=8)
    num_of_neurones = 32
    num_of_hidden_layers = 2
    num_of_inputs = 16
    num_of_outputs = 8
    batch = 8

    key = jax.random.PRNGKey(0)
    keys = jax.random.split(key, 2 + num_of_hidden_layers + 1)

    x = jax.random.normal(keys[0], (batch, num_of_inputs), jnp.float32)

    w_in, b_in = init_linear_params(keys[1], num_of_inputs, num_of_neurones)
    hid_params = [init_linear_params(keys[2 + i], num_of_neurones, num_of_neurones)
                  for i in range(num_of_hidden_layers)]
    w_hid = jnp.stack([w for w, _ in hid_params])          # (L, N, N)
    b_hid = jnp.stack([b for _, b in hid_params])          # (L, N)
    w_out, b_out = init_linear_params(keys[2 + num_of_hidden_layers],
                                      num_of_neurones, num_of_outputs)

    out = mlp_forward(x, w_in, b_in, w_hid, b_hid, w_out, b_out)
    out = jax.block_until_ready(out)

    # Reference check in plain JAX (unfolded layer-by-layer forward).
    h_ref = jnp.maximum(x @ w_in + b_in, 0.0)
    for i in range(num_of_hidden_layers):
        h_ref = h_ref @ w_hid[i] + b_hid[i]
    y_ref = jax.nn.sigmoid(h_ref @ w_out + b_out)
    assert out.shape == y_ref.shape, "shape mismatch vs reference"
    assert jnp.allclose(out, y_ref, atol=1e-4, rtol=1e-4), "mismatch vs reference"

    print("KERNEL_OK")
</pallas_src>

<mosaic_0001>
module attributes {stable_mosaic.version = 11 : i64} {
  func.func @mlp_kernel(%arg0: i32, %arg1: memref<8x128xf32, #tpu.memory_space<vmem>>, %arg2: memref<128x128xf32, #tpu.memory_space<vmem>>, %arg3: memref<1x128xf32, #tpu.memory_space<vmem>>, %arg4: memref<128x128xf32, #tpu.memory_space<vmem>>, %arg5: memref<1x128xf32, #tpu.memory_space<vmem>>, %arg6: memref<8x128xf32, #tpu.memory_space<vmem>>) attributes {dimension_semantics = [#tpu.dimension_semantics<parallel>], iteration_bounds = array<i64: 1>, scalar_prefetch = 0 : i64, scratch_operands = 0 : i64, tpu.core_type = #tpu.core_type<tc>, window_params = [{transform_indices = @transform_0, window_bounds = array<i64: 8, 128>}, {pipeline_mode = #tpu.pipeline_mode<synchronous>, transform_indices = @transform_1, window_bounds = array<i64: 128, 128>}, {pipeline_mode = #tpu.pipeline_mode<synchronous>, transform_indices = @transform_2, window_bounds = array<i64: 1, 128>}, {pipeline_mode = #tpu.pipeline_mode<synchronous>, transform_indices = @transform_3, window_bounds = array<i64: 128, 128>}, {pipeline_mode = #tpu.pipeline_mode<synchronous>, transform_indices = @transform_4, window_bounds = array<i64: 1, 128>}, {transform_indices = @transform_5, window_bounds = array<i64: 8, 128>}]} {
    %c0 = arith.constant 0 : index
    %c0_0 = arith.constant 0 : index
    %0 = vector.load %arg1[%c0, %c0_0] : memref<8x128xf32, #tpu.memory_space<vmem>>, vector<8x128xf32>
    %c0_1 = arith.constant 0 : index
    %c0_2 = arith.constant 0 : index
    %1 = vector.load %arg2[%c0_1, %c0_2] : memref<128x128xf32, #tpu.memory_space<vmem>>, vector<128x128xf32>
    %cst = arith.constant dense<0.000000e+00> : vector<8x128xf32>
    %2 = tpu.matmul %0, %1, %cst {dimension_numbers = #tpu.dot_dimension_numbers<[1], [0], [0], [1], [0, 0, 1, 1], [], []>} : vector<8x128xf32>, vector<128x128xf32>, vector<8x128xf32> -> vector<8x128xf32>
    %c0_3 = arith.constant 0 : index
    %c0_4 = arith.constant 0 : index
    %3 = vector.load %arg3[%c0_3, %c0_4] : memref<1x128xf32, #tpu.memory_space<vmem>>, vector<1x128xf32>
    %4 = vector.broadcast %3 : vector<1x128xf32> to vector<8x128xf32>
    %5 = arith.addf %2, %4 : vector<8x128xf32>
    %cst_5 = arith.constant 0.000000e+00 : f32
    %6 = vector.broadcast %cst_5 : f32 to vector<8x128xf32>
    %7 = arith.maximumf %5, %6 : vector<8x128xf32>
    %c0_6 = arith.constant 0 : index
    %c0_7 = arith.constant 0 : index
    %8 = vector.load %arg4[%c0_6, %c0_7] : memref<128x128xf32, #tpu.memory_space<vmem>>, vector<128x128xf32>
    %cst_8 = arith.constant dense<0.000000e+00> : vector<8x128xf32>
    %9 = tpu.matmul %7, %8, %cst_8 {dimension_numbers = #tpu.dot_dimension_numbers<[1], [0], [0], [1], [0, 0, 1, 1], [], []>} : vector<8x128xf32>, vector<128x128xf32>, vector<8x128xf32> -> vector<8x128xf32>
    %c0_9 = arith.constant 0 : index
    %c0_10 = arith.constant 0 : index
    %10 = vector.load %arg5[%c0_9, %c0_10] : memref<1x128xf32, #tpu.memory_space<vmem>>, vector<1x128xf32>
    %11 = vector.broadcast %10 : vector<1x128xf32> to vector<8x128xf32>
    %12 = arith.addf %9, %11 : vector<8x128xf32>
    %13 = arith.negf %12 : vector<8x128xf32>
    %14 = math.exp %13 : vector<8x128xf32>
    %cst_11 = arith.constant 1.000000e+00 : f32
    %15 = vector.broadcast %cst_11 : f32 to vector<8x128xf32>
    %16 = arith.addf %15, %14 : vector<8x128xf32>
    %17 = arith.divf %15, %16 : vector<8x128xf32>
    %c0_12 = arith.constant 0 : index
    %c0_13 = arith.constant 0 : index
    %18 = vector.load %arg6[%c0_12, %c0_13] : memref<8x128xf32, #tpu.memory_space<vmem>>, vector<8x128xf32>
    tpu.vector_store %arg6[%c0_12, %c0_13], %17 {strides = array<i32>} : memref<8x128xf32, #tpu.memory_space<vmem>>, vector<8x128xf32>,
    return
  }
  func.func @transform_0(%arg0: i32) -> (i32, i32) {
    %c0_i32 = arith.constant 0 : i32
    %c0_i32_0 = arith.constant 0 : i32
    return %arg0, %c0_i32 : i32, i32
  }
  func.func @transform_1(%arg0: i32) -> (i32, i32) {
    %c0_i32 = arith.constant 0 : i32
    %c0_i32_0 = arith.constant 0 : i32
    %c0_i32_1 = arith.constant 0 : i32
    return %c0_i32, %c0_i32_0 : i32, i32
  }
  func.func @transform_2(%arg0: i32) -> (i32, i32) {
    %c0_i32 = arith.constant 0 : i32
    %c0_i32_0 = arith.constant 0 : i32
    %c0_i32_1 = arith.constant 0 : i32
    return %c0_i32, %c0_i32_0 : i32, i32
  }
  func.func @transform_3(%arg0: i32) -> (i32, i32) {
    %c0_i32 = arith.constant 0 : i32
    %c0_i32_0 = arith.constant 0 : i32
    %c0_i32_1 = arith.constant 0 : i32
    return %c0_i32, %c0_i32_0 : i32, i32
  }
  func.func @transform_4(%arg0: i32) -> (i32, i32) {
    %c0_i32 = arith.constant 0 : i32
    %c0_i32_0 = arith.constant 0 : i32
    %c0_i32_1 = arith.constant 0 : i32
    return %c0_i32, %c0_i32_0 : i32, i32
  }
  func.func @transform_5(%arg0: i32) -> (i32, i32) {
    %c0_i32 = arith.constant 0 : i32
    %c0_i32_0 = arith.constant 0 : i32
    return %arg0, %c0_i32 : i32, i32
  }
}

</mosaic_0001>

<bundles_post_ra>
// kernel: tpu_custom_call.1
= control target key start
LH: loop header
LB: loop body
LE: loop exit
PB: predicated region body
PF: predicated region fallthrough
CT: control target
= control target key end

     0   :  { %10 = vsyncpa [#allocation3], 0  ;;  %s648_s0 = inlined_call_operand.hbm [shape: f32[8,128], index: 0, kind: input, shape index: {}]   ;;  %s649_s1 = inlined_call_operand.hbm [shape: f32[128,128], index: 1, kind: input, shape index: {}]   ;;  %s650_s2 = inlined_call_operand.vmem [shape: f32[1,128], index: 2, kind: input, shape index: {}]   ;;  %s651_s3 = inlined_call_operand.hbm [shape: f32[128,128], index: 3, kind: input, shape index: {}]   ;;  %s652_s4 = inlined_call_operand.vmem [shape: f32[1,128], index: 4, kind: input, shape index: {}]   ;;  %s653_s5 = inlined_call_operand.hbm [shape: f32[8,128], index: 5, kind: output, shape index: {}]  }
   0x1   :  { %11 = vsyncpa [#allocation6], 0 }
   0x2   :  { %12 = vsyncpa [#allocation4], 0  ;;  %s533_s18 = smov [#allocation5]   ;;  %s439_s22 = scalar_lea.hbm %s649_s1, 2048 }
   0x3   :  { %s28_s19 = sshll.u32 %s533_s18, 4  ;;  %p440_p0 = scmp.ne.s32.totalorder %s649_s1, %s439_s22  ;;  %s29_s19 = int_to_ptr.vmem [resolvable:$true] %s28_s19 }
   0x4   :  { %p443_p1 = scmp.lt.u32.totalorder %s439_s22, %s649_s1 }
   0x6   :  { %p445_p2 = pnand %p443_p1, %p440_p0 }
   0x8   :  { %448 = shalt.err (!%p445_p2)
}
   0x9   :  { %s449_s27 = scalar_lea.vmem %s29_s19, 2048  ;;  %p454_p4 = scmp.lt.s32.totalorder %s29_s19, %s29_s19 }
   0xa   :  { %p450_p3 = scmp.ne.s32.totalorder %s29_s19, %s449_s27  ;;  %p455_p5 = scmp.lt.s32.totalorder %s449_s27, %s449_s27 }
   0xc   :  { %p456_p6 = por %p455_p5, %p454_p4 }
   0xe   :  { %p457_p7 = pnand %p456_p6, %p450_p3 }
  0x10   :  { %460 = shalt.err (!%p457_p7)
}
  0x11   :  { %s534_s28 = smov 128   ;;  %s535_s29 = smov 8  }
  0x12   :  { %34 = dma.hbm_to_vmem [thread:$0]  %s649_s1, 2048, %s29_s19, [#allocation6], %s534_s28, %s534_s28, %s535_s29  }
  0x13   :  { %s536_s7 = smov [#allocation2]   ;;  %s537_s9 = smov [#allocation7]  }
  0x14   :  { %s19_s8 = sshll.u32 %s536_s7, 4  ;;  %s42_s10 = sshll.u32 %s537_s9, 4  ;;  %s20_s8 = int_to_ptr.vmem [resolvable:$true] %s19_s8  ;;  %s43_s10 = int_to_ptr.vmem [resolvable:$true] %s42_s10 }
  0x15   :  { %s461_s13 = scalar_lea.hbm %s648_s0, 128 }
  0x16   :  { %p462_p8 = scmp.ne.s32.totalorder %s648_s0, %s461_s13  ;;  %p465_p9 = scmp.lt.u32.totalorder %s461_s13, %s648_s0 }
  0x18   :  { %p467_p10 = pnand %p465_p9, %p462_p8 }
  0x1a   :  { %470 = shalt.err (!%p467_p10)
}
  0x1b   :  { %s471_s1 = scalar_lea.vmem %s20_s8, 128  ;;  %p476_p12 = scmp.lt.s32.totalorder %s20_s8, %s20_s8 }
  0x1c   :  { %p472_p11 = scmp.ne.s32.totalorder %s20_s8, %s471_s1  ;;  %p477_p13 = scmp.lt.s32.totalorder %s471_s1, %s471_s1 }
  0x1e   :  { %p478_p0 = por %p477_p13, %p476_p12 }
  0x20   :  { %p479_p1 = pnand %p478_p0, %p472_p11 }
  0x22   :  { %482 = shalt.err (!%p479_p1)
}
  0x23   :  { %22 = dma.hbm_to_vmem [thread:$0]  %s648_s0, 128, %s20_s8, [#allocation3]  }
  0x24   :  { %s483_s22 = scalar_lea.hbm %s651_s3, 2048 }
  0x25   :  { %p484_p2 = scmp.ne.s32.totalorder %s651_s3, %s483_s22  ;;  %p487_p3 = scmp.lt.u32.totalorder %s483_s22, %s651_s3 }
  0x27   :  { %p489_p4 = pnand %p487_p3, %p484_p2 }
  0x29   :  { %492 = shalt.err (!%p489_p4)
}
  0x2a   :  { %s493_s27 = scalar_lea.vmem %s43_s10, 2048  ;;  %p498_p6 = scmp.lt.s32.totalorder %s43_s10, %s43_s10 }
  0x2b   :  { %p494_p5 = scmp.ne.s32.totalorder %s43_s10, %s493_s27  ;;  %p499_p7 = scmp.lt.s32.totalorder %s493_s27, %s493_s27 }
  0x2d   :  { %p500_p8 = por %p499_p7, %p498_p6 }
  0x2f   :  { %p501_p9 = pnand %p500_p8, %p494_p5 }
  0x31   :  { %504 = shalt.err (!%p501_p9)
}
  0x32   :  { %48 = dma.hbm_to_vmem [thread:$0]  %s651_s3, 2048, %s43_s10, [#allocation6], %s534_s28, %s534_s28, %s535_s29  }
  0x33   :  { %527 = dma.done.wait [#allocation3], 128  }
  0x34   :  { %528 = vsyncadd [#allocation3], 4294967168 }
  0x35   :  { %529 = dma.done.wait [#allocation6], 4096  }
  0x36   :  { %530 = vsyncadd [#allocation6], 4294963200  ;;  %v538_v0 = vmov 0.0|0.0   ;;  %vm539_vm0 = vmmov 0   ;;  %v540_v1 = vmov 0.0   ;;  %v61_v2 = vld [vmem:[#allocation5] sm:$0xff] }
  0x37   :  { %378 = vmatprep.subr.bf16.mxu0 %v538_v0  ;;  %340 = vmatprep.mubr.msk.f32.mxu0 %vm539_vm0, %v540_v1  ;;  %v62_v3 = vld [vmem:[#allocation5 + $0x8] sm:$0xff]  ;;  %v63_v4 = vld [vmem:[#allocation5 + $0x10] sm:$0xff]  ;;  %v64_v6 = vld [vmem:[#allocation5 + $0x18] sm:$0xff]  ;;  %s541_s7 = smov [#allocation8]  }
  0x38   :  { %402 = vmatprep.subr.bf16.mxu1 %v538_v0  ;;  %375 = vmatprep.mubr.msk.f32.mxu1 %vm539_vm0, %v540_v1  ;;  %v379_v5 = vpack.c.bf16 %v62_v3, %v61_v2  ;;  %v382_v7 = vpack.c.bf16 %v64_v6, %v63_v4  ;;  %v65_v8 = vld [vmem:[#allocation5 + $0x20] sm:$0xff]  ;;  %v66_v9 = vld [vmem:[#allocation5 + $0x28] sm:$0xff]  ;;  %v157_v12 = vld [vmem:[#allocation7 + $0x10] sm:$0xff]  ;;  %s261_s8 = sshll.u32 %s541_s7, 4  ;;  %s262_s8 = int_to_ptr.vmem [resolvable:$true] %s261_s8 }
  0x39   :  { %v155_v10 = vld [vmem:[#allocation7] sm:$0xff]  ;;  %v156_v11 = vld [vmem:[#allocation7 + $0x8] sm:$0xff]  ;;  %v158_v13 = vld [vmem:[#allocation7 + $0x18] sm:$0xff]  ;;  %v385_v14 = vpack.c.bf16 %v66_v9, %v65_v8  ;;  %p510_p11 = scmp.lt.s32.totalorder %s262_s8, %s262_s8 }
  0x3a   :  { %380 = vmatpush3.bf16.msra.mxu0 %v379_v5  ;;  %v403_v15 = vpack.c.bf16 %v156_v11, %v155_v10  ;;  %v67_v16 = vld [vmem:[#allocation5 + $0x30] sm:$0xff]  ;;  %v68_v17 = vld [vmem:[#allocation5 + $0x38] sm:$0xff]  ;;  %v406_v18 = vpack.c.bf16 %v158_v13, %v157_v12  ;;  %v159_v19 = vld [vmem:[#allocation7 + $0x20] sm:$0xff] }
  0x3b   :  { %381 = vmatprep.subr.bf16.mxu0 %v538_v0  ;;  %v160_v20 = vld [vmem:[#allocation7 + $0x28] sm:$0xff]  ;;  %v388_v21 = vpack.c.bf16 %v68_v17, %v67_v16  ;;  %v69_v22 = vld [vmem:[#allocation5 + $0x40] sm:$0xff]  ;;  %v161_v25 = vld [vmem:[#allocation7 + $0x30] sm:$0xff] }
  0x3c   :  { %404 = vmatpush3.bf16.msra.mxu1 %v403_v15  ;;  %v70_v23 = vld [vmem:[#allocation5 + $0x48] sm:$0xff]  ;;  %v409_v24 = vpack.c.bf16 %v160_v20, %v159_v19  ;;  %v162_v26 = vld [vmem:[#allocation7 + $0x38] sm:$0xff]  ;;  %v71_v28 = vld [vmem:[#allocation5 + $0x50] sm:$0xff] }
  0x3d   :  { %405 = vmatprep.subr.bf16.mxu1 %v538_v0  ;;  %v391_v27 = vpack.c.bf16 %v70_v23, %v69_v22  ;;  %v72_v29 = vld [vmem:[#allocation5 + $0x58] sm:$0xff]  ;;  %v412_v30 = vpack.c.bf16 %v162_v26, %v161_v25  ;;  %v163_v31 = vld [vmem:[#allocation7 + $0x40] sm:$0xff]  ;;  %v164_v32 = vld [vmem:[#allocation7 + $0x48] sm:$0xff] }
  0x3e   :  { %383 = vmatpush3.bf16.msra.mxu0 %v382_v7  ;;  %v394_v33 = vpack.c.bf16 %v72_v29, %v71_v28  ;;  %v73_v34 = vld [vmem:[#allocation5 + $0x60] sm:$0xff]  ;;  %v74_v35 = vld [vmem:[#allocation5 + $0x68] sm:$0xff]  ;;  %v415_v36 = vpack.c.bf16 %v164_v32, %v163_v31  ;;  %v165_v37 = vld [vmem:[#allocation7 + $0x50] sm:$0xff] }
  0x3f   :  { %384 = vmatprep.subr.bf16.mxu0 %v538_v0  ;;  %v166_v38 = vld [vmem:[#allocation7 + $0x58] sm:$0xff]  ;;  %v397_v39 = vpack.c.bf16 %v74_v35, %v73_v34  ;;  %v75_v40 = vld [vmem:[#allocation5 + $0x70] sm:$0xff]  ;;  %v167_v43 = vld [vmem:[#allocation7 + $0x60] sm:$0xff] }
  0x40   :  { %407 = vmatpush3.bf16.msra.mxu1 %v406_v18  ;;  %v76_v41 = vld [vmem:[#allocation5 + $0x78] sm:$0xff]  ;;  %v418_v42 = vpack.c.bf16 %v166_v38, %v165_v37  ;;  %v168_v44 = vld [vmem:[#allocation7 + $0x68] sm:$0xff]  ;;  %v169_v48 = vld [vmem:[#allocation7 + $0x70] sm:$0xff] }
  0x41   :  { %408 = vmatprep.subr.bf16.mxu1 %v538_v0  ;;  %v400_v45 = vpack.c.bf16 %v76_v41, %v75_v40  ;;  %v421_v46 = vpack.c.bf16 %v168_v44, %v167_v43  ;;  %v60_v47 = vld [vmem:[#allocation2] sm:$0xff] }
  0x42   :  { %386 = vmatpush3.bf16.msra.mxu0 %v385_v14  ;;  %v170_v49 = vld [vmem:[#allocation7 + $0x78] sm:$0xff] }
  0x43   :  { %387 = vmatprep.subr.bf16.mxu0 %v538_v0  ;;  %v424_v50 = vpack.c.bf16 %v170_v49, %v169_v48  ;;  %v271_v51 = vld [vmem:[%s650_s2] ss:$0 sm:$0xff]  ;;  %s505_s2 = scalar_lea.vmem %s262_s8, 128 }
  0x44   :  { %410 = vmatpush3.bf16.msra.mxu1 %v409_v24  ;;  %v272_v56 = vld [vmem:[%s652_s4] ss:$0 sm:$0xff]  ;;  %p506_p10 = scmp.ne.s32.totalorder %s262_s8, %s505_s2  ;;  %p511_p12 = scmp.lt.s32.totalorder %s505_s2, %s505_s2 }
  0x45   :  { %411 = vmatprep.subr.bf16.mxu1 %v538_v0 }
  0x46   :  { %389 = vmatpush3.bf16.msra.mxu0 %v388_v21  ;;  %p512_p13 = por %p511_p12, %p510_p11 }
  0x47   :  { %390 = vmatprep.subr.bf16.mxu0 %v538_v0 }
  0x48   :  { %413 = vmatpush3.bf16.msra.mxu1 %v412_v30  ;;  %p513_p0 = pnand %p512_p13, %p506_p10 }
  0x49   :  { %414 = vmatprep.subr.bf16.mxu1 %v538_v0 }
  0x4a   :  { %392 = vmatpush3.bf16.msra.mxu0 %v391_v27 }
  0x4b   :  { %393 = vmatprep.subr.bf16.mxu0 %v538_v0 }
  0x4c   :  { %416 = vmatpush3.bf16.msra.mxu1 %v415_v36 }
  0x4d   :  { %417 = vmatprep.subr.bf16.mxu1 %v538_v0 }
  0x4e   :  { %395 = vmatpush3.bf16.msra.mxu0 %v394_v33 }
  0x4f   :  { %396 = vmatprep.subr.bf16.mxu0 %v538_v0 }
  0x50   :  { %419 = vmatpush3.bf16.msra.mxu1 %v418_v42 }
  0x51   :  { %420 = vmatprep.subr.bf16.mxu1 %v538_v0 }
  0x52   :  { %398 = vmatpush3.bf16.msra.mxu0 %v397_v39 }
  0x53   :  { %399 = vmatprep.subr.bf16.mxu0 %v538_v0 }
  0x54   :  { %422 = vmatpush3.bf16.msra.mxu1 %v421_v46 }
  0x55   :  { %423 = vmatprep.subr.bf16.mxu1 %v538_v0 }
  0x56   :  { %401 = vmatpush3.bf16.msra.mxu0 %v400_v45 }
  0x58   :  { %425 = vmatpush3.bf16.msra.mxu1 %v424_v50 }
  0x59   :  { %341 = vmatmul.mubr.f32.vlgmr.msra.gmra.mrb[0].mxu0 %v60_v47 }
 0x12c   :  { %v150_v52 = vpop.f32.mrb[0].mxu0 }
 0x12d   :  { %v151_v53 = vadd.f32 %v271_v51, %v150_v52  ;;  %v342_v54 = vpop.f32.mrb[1].mxu0 }
 0x12f   :  { %v154_v55 = vmax.f32 %v151_v53, 0.0 }
 0x131   :  { %376 = vmatmul.mubr.f32.vlgmr.msra.gmra.mrb[0].mxu1 %v154_v55 }
 0x204   :  { %v244_v57 = vpop.f32.mrb[0].mxu1 }
 0x205   :  { %v245_v58 = vadd.f32 %v272_v56, %v244_v57  ;;  %v377_v59 = vpop.f32.mrb[1].mxu1 }
 0x207   :  { %v273_v60 = vmul.f32 -1.442695, %v245_v58 }
 0x209   :  { %435 = vpow2.f32 %v273_v60 }
 0x213   :  { %v436_v61 = vpop.eup %435 }
 0x214   :  { %v251_v62 = vadd.f32 1.0, %v436_v61 }
 0x216   :  { %437 = vrcp.f32 %v251_v62 }
 0x220   :  { %v438_v63 = vpop.eup %437 }
 0x221   :  { %254 = vst [vmem:[#allocation8] sm:$0xff] %v438_v63 }
 0x222   :  { %516 = shalt.err (!%p513_p0)
}
 0x223   :  { %s517_s10 = scalar_lea.hbm %s653_s5, 128 }
 0x224   :  { %p518_p1 = scmp.ne.s32.totalorder %s653_s5, %s517_s10  ;;  %p521_p2 = scmp.lt.u32.totalorder %s517_s10, %s653_s5 }
 0x226   :  { %p523_p3 = pnand %p521_p2, %p518_p1 }
 0x228   :  { %526 = shalt.err (!%p523_p3)
}
 0x229   :  { %264 = dma.vmem_to_hbm [thread:$0]  %s262_s8, 128, %s653_s5, [#allocation4]  }
 0x22a   :  { %531 = dma.done.wait [#allocation4], 128  }
 0x22b   :  { %532 = vsyncadd [#allocation4], 4294967168 }
 0x22c   :  { %268 = vsyncpa [#allocation3], 1 }
 0x22d   :  { %269 = vsyncpa [#allocation6], 1 }
 0x22e   :  { %270 = vsyncpa [#allocation4], 1 }

</bundles_post_ra>
